<compile_context>
chip_gen: v6e
topology: v6e:2x2x1
jax: 0.10.0
libtpu: 0.0.40
codegen_flags: <defaults>
</compile_context>

<pallas_src>
import jax
import jax.numpy as jnp
from jax.experimental import pallas as pl
from jax.experimental.pallas import tpu as pltpu


def _affine_permute_kernel(x_ref, w_ref, b_ref, o_ref):
    # x_ref: (TC, TB, HW)   channel-major input tile for one (c-tile, b-tile)
    # w_ref: (TC, 1)        per-channel scale (f32)
    # b_ref: (TC, 1)        per-channel shift (f32)
    # o_ref: (TB, TC, HW)   NCHW-ordered output tile
    w = w_ref[...]                              # (TC, 1) f32
    b = b_ref[...]                              # (TC, 1) f32
    tb = o_ref.shape[0]

    def write_one(t):
        xt = x_ref[:, t, :].astype(jnp.float32)             # (TC, HW), f32 compute
        o_ref[t, :, :] = (xt * w + b).astype(o_ref.dtype)    # contiguous store

    if tb <= 16:
        # Fully static indexing (test-sized and typical small-batch blocks).
        for t in range(tb):
            write_one(t)
    else:
        def body(t, carry):
            write_one(t)
            return carry
        jax.lax.fori_loop(0, tb, body, 0, unroll=4)


def _sublane_unit(dtype):
    # 8 sublanes of 32-bit; sub-32-bit dtypes pack along sublanes.
    return max(8, 32 // jnp.dtype(dtype).itemsize)


def _tile_options(dim, unit):
    """Legal sublane-facing tile sizes: the full dim plus every divisor of dim
    that is a multiple of `unit`. Descending."""
    opts = {dim}
    t = unit
    while t < dim:
        if dim % t == 0:
            opts.add(t)
        t += unit
    return sorted(opts, reverse=True)


def _choose_tiles(C, B, HW, itemsize, unit, block_budget_bytes):
    """Pick (tc, tb) maximizing the block size under the VMEM budget."""
    best = None
    for tc in _tile_options(C, unit):
        for tb in _tile_options(B, unit):
            blk = tc * tb * HW * itemsize
            if blk <= block_budget_bytes:
                key = (tc * tb, tb, tc)
                if best is None or key > best[0]:
                    best = (key, tc, tb)
    if best is not None:
        return best[1], best[2]
    # Nothing fits the budget (pathological shapes): smallest legal block,
    # still full HW; vmem_limit is raised accordingly by the caller.
    return min(_tile_options(C, unit)), min(_tile_options(B, unit))


def batchnorm2d_module2(output2, weight, bias, batchsize, channels, height, width):
    """output2: [C, B*H*W] -> [B, C, H, W] (matches the PyTorch module forward)."""
    B, C, H, W = int(batchsize), int(channels), int(height), int(width)
    HW = H * W

    x = output2.reshape(C, B, HW)                 # free metadata reshape, no HBM pass
    itemsize = jnp.dtype(x.dtype).itemsize
    w2 = weight.reshape(C, 1).astype(jnp.float32)  # params stay f32 (PyTorch path)
    b2 = bias.reshape(C, 1).astype(jnp.float32)

    # ~6 MiB per block -> ~24-26 MiB live with double-buffered in+out blocks:
    # past the HBM-roofline knee on v5e/v6e/v7x and well under v7x's 64 MiB VMEM.
    unit = _sublane_unit(x.dtype)
    block_budget = 6 * 1024 * 1024
    tc, tb = _choose_tiles(C, B, HW, itemsize, unit, block_budget)
    n_c, n_b = C // tc, B // tb

    block_bytes = tc * tb * HW * itemsize
    live_bytes = 4 * block_bytes + 4 * C * 4 + (2 << 20)   # 2x in + 2x out + params + slack
    vmem_limit_bytes = min(max(32 << 20, live_bytes), 48 << 20)
    if live_bytes > vmem_limit_bytes:                      # oversize fallback shapes only
        vmem_limit_bytes = live_bytes

    out3 = pl.pallas_call(
        _affine_permute_kernel,
        out_shape=jax.ShapeDtypeStruct((B, C, HW), x.dtype),
        grid_spec=pltpu.PrefetchScalarGridSpec(
            num_scalar_prefetch=0,
            # Channel axis outermost so weight/bias tiles stay resident across
            # all batch steps of a given channel tile.
            grid=(n_c, n_b),
            in_specs=[
                pl.BlockSpec((tc, tb, HW), lambda c, b: (c, b, 0)),
                pl.BlockSpec((tc, 1), lambda c, b: (c, 0)),
                pl.BlockSpec((tc, 1), lambda c, b: (c, 0)),
            ],
            out_specs=pl.BlockSpec((tb, tc, HW), lambda c, b: (b, c, 0)),
        ),
        compiler_params=pltpu.CompilerParams(
            dimension_semantics=("parallel", "parallel"),
            vmem_limit_bytes=int(vmem_limit_bytes),
        ),
        cost_estimate=pl.CostEstimate(
            flops=2 * B * C * HW,
            bytes_accessed=2 * B * C * HW * itemsize + 2 * C * 4,
            transcendentals=0,
        ),
    )(x, w2, b2)

    return out3.reshape(B, C, H, W)


if __name__ == "__main__":
    key = jax.random.PRNGKey(0)
    B, C, H, W = 2, 4, 16, 16
    k1, k2 = jax.random.split(key)

    # output2 laid out as the module expects: [C, B*H*W]
    x = jax.random.normal(k1, (C, B * H * W), dtype=jnp.float32)
    weight = jax.random.uniform(k2, (C,), dtype=jnp.float32)   # init.uniform_
    bias = jnp.zeros((C,), dtype=jnp.float32)                  # init.zeros_

    out = batchnorm2d_module2(x, weight, bias, B, C, H, W)
    out = jax.block_until_ready(out)

    # Plain-JAX reference with identical semantics to the PyTorch forward.
    ref = (x * weight[:, None] + bias[:, None]).reshape(C, B, H, W).transpose(1, 0, 2, 3)
    assert out.shape == (B, C, H, W), out.shape
    assert jnp.allclose(out, ref, atol=1e-6, rtol=1e-6), "mismatch vs reference"

    print("KERNEL_OK")
</pallas_src>

<mosaic_0001>
module attributes {stable_mosaic.version = 11 : i64} {
  func.func @_affine_permute_kernel(%arg0: i32, %arg1: i32, %arg2: memref<4x2x256xf32, #tpu.memory_space<vmem>>, %arg3: memref<4x1xf32, #tpu.memory_space<vmem>>, %arg4: memref<4x1xf32, #tpu.memory_space<vmem>>, %arg5: memref<2x4x256xf32, #tpu.memory_space<vmem>>) attributes {dimension_semantics = [#tpu.dimension_semantics<parallel>, #tpu.dimension_semantics<parallel>], iteration_bounds = array<i64: 1, 1>, scalar_prefetch = 0 : i64, scratch_operands = 0 : i64, tpu.core_type = #tpu.core_type<tc>, window_params = [{transform_indices = @transform_0, window_bounds = array<i64: 4, 2, 256>}, {transform_indices = @transform_1, window_bounds = array<i64: 4, 1>}, {transform_indices = @transform_2, window_bounds = array<i64: 4, 1>}, {transform_indices = @transform_3, window_bounds = array<i64: 2, 4, 256>}]} {
    %c0 = arith.constant 0 : index
    %c0_0 = arith.constant 0 : index
    %0 = vector.load %arg3[%c0, %c0_0] : memref<4x1xf32, #tpu.memory_space<vmem>>, vector<4x1xf32>
    %c0_1 = arith.constant 0 : index
    %c0_2 = arith.constant 0 : index
    %1 = vector.load %arg4[%c0_1, %c0_2] : memref<4x1xf32, #tpu.memory_space<vmem>>, vector<4x1xf32>
    %c0_3 = arith.constant 0 : index
    %c0_4 = arith.constant 0 : index
    %c0_5 = arith.constant 0 : index
    %2 = vector.load %arg2[%c0_3, %c0_4, %c0_5] : memref<4x2x256xf32, #tpu.memory_space<vmem>>, vector<4x1x256xf32>
    %3 = vector.shape_cast %2 : vector<4x1x256xf32> to vector<4x256xf32>
    %4 = vector.broadcast %0 : vector<4x1xf32> to vector<4x256xf32>
    %5 = arith.mulf %3, %4 : vector<4x256xf32>
    %6 = vector.broadcast %1 : vector<4x1xf32> to vector<4x256xf32>
    %7 = arith.addf %5, %6 : vector<4x256xf32>
    %c0_6 = arith.constant 0 : index
    %c0_7 = arith.constant 0 : index
    %c0_8 = arith.constant 0 : index
    %8 = vector.load %arg5[%c0_6, %c0_7, %c0_8] : memref<2x4x256xf32, #tpu.memory_space<vmem>>, vector<1x4x256xf32>
    %9 = vector.shape_cast %8 : vector<1x4x256xf32> to vector<4x256xf32>
    %10 = vector.shape_cast %7 : vector<4x256xf32> to vector<1x4x256xf32>
    tpu.vector_store %arg5[%c0_6, %c0_7, %c0_8], %10 {strides = array<i32>} : memref<2x4x256xf32, #tpu.memory_space<vmem>>, vector<1x4x256xf32>,
    %c0_9 = arith.constant 0 : index
    %c1 = arith.constant 1 : index
    %c0_10 = arith.constant 0 : index
    %11 = vector.load %arg2[%c0_9, %c1, %c0_10] : memref<4x2x256xf32, #tpu.memory_space<vmem>>, vector<4x1x256xf32>
    %12 = vector.shape_cast %11 : vector<4x1x256xf32> to vector<4x256xf32>
    %13 = vector.broadcast %0 : vector<4x1xf32> to vector<4x256xf32>
    %14 = arith.mulf %12, %13 : vector<4x256xf32>
    %15 = vector.broadcast %1 : vector<4x1xf32> to vector<4x256xf32>
    %16 = arith.addf %14, %15 : vector<4x256xf32>
    %c1_11 = arith.constant 1 : index
    %c0_12 = arith.constant 0 : index
    %c0_13 = arith.constant 0 : index
    %17 = vector.load %arg5[%c1_11, %c0_12, %c0_13] : memref<2x4x256xf32, #tpu.memory_space<vmem>>, vector<1x4x256xf32>
    %18 = vector.shape_cast %17 : vector<1x4x256xf32> to vector<4x256xf32>
    %19 = vector.shape_cast %16 : vector<4x256xf32> to vector<1x4x256xf32>
    tpu.vector_store %arg5[%c1_11, %c0_12, %c0_13], %19 {strides = array<i32>} : memref<2x4x256xf32, #tpu.memory_space<vmem>>, vector<1x4x256xf32>,
    return
  }
  func.func @transform_0(%arg0: i32, %arg1: i32) -> (i32, i32, i32) {
    %c0_i32 = arith.constant 0 : i32
    %c0_i32_0 = arith.constant 0 : i32
    return %arg0, %arg1, %c0_i32 : i32, i32, i32
  }
  func.func @transform_1(%arg0: i32, %arg1: i32) -> (i32, i32) {
    %c0_i32 = arith.constant 0 : i32
    %c0_i32_0 = arith.constant 0 : i32
    return %arg0, %c0_i32 : i32, i32
  }
  func.func @transform_2(%arg0: i32, %arg1: i32) -> (i32, i32) {
    %c0_i32 = arith.constant 0 : i32
    %c0_i32_0 = arith.constant 0 : i32
    return %arg0, %c0_i32 : i32, i32
  }
  func.func @transform_3(%arg0: i32, %arg1: i32) -> (i32, i32, i32) {
    %c0_i32 = arith.constant 0 : i32
    %c0_i32_0 = arith.constant 0 : i32
    return %arg1, %arg0, %c0_i32 : i32, i32, i32
  }
}

</mosaic_0001>

<bundles_post_ra>
// kernel: tpu_custom_call.1
= control target key start
LH: loop header
LB: loop body
LE: loop exit
PB: predicated region body
PF: predicated region fallthrough
CT: control target
= control target key end

     0   :  { %8 = vsyncpa [#allocation3], 0  ;;  %s283_s0 = inlined_call_operand.hbm [shape: f32[4,2,256], index: 0, kind: input, shape index: {}]   ;;  %s284_s1 = inlined_call_operand.vmem [shape: f32[4,1], index: 1, kind: input, shape index: {}]   ;;  %s285_s2 = inlined_call_operand.vmem [shape: f32[4,1], index: 2, kind: input, shape index: {}]   ;;  %s286_s3 = inlined_call_operand.hbm [shape: f32[2,4,256], index: 3, kind: output, shape index: {}]  }
   0x1   :  { %9 = vsyncpa [#allocation4], 0  ;;  %s243_s12 = smov [#allocation2]  }
   0x2   :  { %s15_s13 = sshll.u32 %s243_s12, 4  ;;  %s16_s13 = int_to_ptr.vmem [resolvable:$true] %s15_s13 }
   0x3   :  { %s207_s14 = scalar_lea.vmem %s16_s13, 256  ;;  %p212_p1 = scmp.lt.s32.totalorder %s16_s13, %s16_s13 }
   0x4   :  { %p208_p0 = scmp.ne.s32.totalorder %s16_s13, %s207_s14  ;;  %p213_p2 = scmp.lt.s32.totalorder %s207_s14, %s207_s14 }
   0x6   :  { %p214_p3 = por %p213_p2, %p212_p1 }
   0x8   :  { %p215_p4 = pnand %p214_p3, %p208_p0 }
   0xa   :  { %218 = shalt.err (!%p215_p4)
}
   0xb   :  { %s244_s15 = smov 64   ;;  %s245_s16 = smov 4  }
   0xc   :  { %21 = dma.hbm_to_vmem [thread:$0]  %s283_s0, 256, %s16_s13, [#allocation3], %s244_s15, %s244_s15, %s245_s16  }
   0xd   :  { %239 = dma.done.wait [#allocation3], 256  }
   0xe   :  { %240 = vsyncadd [#allocation3], 4294967040  ;;  %v246_v0 = vmov 0   ;;  %v29_v1 = vld [vmem:[%s284_s1] sm:$0xf]  ;;  %v42_v3 = vlaneseq  ;;  %s248_s0 = smov [#allocation5]  }
   0xf   :  { %198 = vset.pattern.permute.xlu0 %v246_v0  ;;  %v30_v2 = vld [vmem:[%s285_s2] sm:$0xf]  ;;  %v247_v5 = vmov 1935823168   ;;  %s176_s1 = sshll.u32 %s248_s0, 4  ;;  %s177_s1 = int_to_ptr.vmem [resolvable:$true] %s176_s1 }
  0x10   :  { %40 = vperm.xlu0 %198, %v29_v1   ;;  %v43_v4 = vshrl.u32 %v42_v3, 7  ;;  %v101_v6 = vunpack.c.l.s4 %v247_v5  ;;  %v31_v13 = vld [vmem:[#allocation2] ss:$2 sm:$0x3]  ;;  %s219_s2 = scalar_lea.vmem %s177_s1, 256  ;;  %p224_p6 = scmp.lt.s32.totalorder %s177_s1, %s177_s1 }
  0x11   :  { %v33_v14 = vld [vmem:[#allocation2 + $0x4] ss:$2 sm:$0x3]  ;;  %v35_v15 = vld [vmem:[#allocation2 + $0x8] ss:$2 sm:$0x3]  ;;  %p220_p5 = scmp.ne.s32.totalorder %s177_s1, %s219_s2  ;;  %p225_p7 = scmp.lt.s32.totalorder %s219_s2, %s219_s2 }
  0x12   :  { %v44_v7 = vsub.s32 0, %v43_v4  ;;  %v48_v8 = vsub.s32 1, %v43_v4  ;;  %v52_v9 = vsub.s32 2, %v43_v4  ;;  %v56_v10 = vsub.s32 3, %v43_v4 }
  0x13   :  { %v102_v11 = vunpack.c.0.s8 %v101_v6  ;;  %v37_v16 = vld [vmem:[#allocation2 + $0xc] ss:$2 sm:$0x3]  ;;  %v125_v21 = vld [vmem:[#allocation2 + $0x1] ss:$2 sm:$0x3]  ;;  %p226_p8 = por %p225_p7, %p224_p6 }
  0x14   :  { %68 = vperm.xlu0 %198, %v30_v2   ;;  %v127_v22 = vld [vmem:[#allocation2 + $0x5] ss:$2 sm:$0x3]  ;;  %v129_v24 = vld [vmem:[#allocation2 + $0x9] ss:$2 sm:$0x3] }
  0x15   :  { %v105_v23 = vsub.s32 %v102_v11, %v43_v4  ;;  %v131_v25 = vld [vmem:[#allocation2 + $0xd] ss:$2 sm:$0x3]  ;;  %p227_p9 = pnand %p226_p8, %p220_p5 }
  0x8b   :  { %v41_v12 = vpop.permute.xlu0 %40 }
  0x8c   :  { %v45_v17 = vrot.slane %v41_v12, %v44_v7  ;;  %v49_v18 = vrot.slane %v41_v12, %v48_v8  ;;  %v53_v19 = vrot.slane %v41_v12, %v52_v9  ;;  %v57_v20 = vrot.slane %v41_v12, %v56_v10 }
  0x8e   :  { %v62_v26 = vmul.f32 %v45_v17, %v31_v13  ;;  %v63_v27 = vmul.f32 %v49_v18, %v33_v14  ;;  %v64_v28 = vmul.f32 %v53_v19, %v35_v15  ;;  %v65_v29 = vmul.f32 %v57_v20, %v37_v16 }
  0x8f   :  { %v69_v30 = vpop.permute.xlu0 %68  ;;  %v132_v35 = vmul.f32 %v125_v21, %v45_v17  ;;  %v133_v36 = vmul.f32 %v127_v22, %v49_v18  ;;  %v134_v37 = vmul.f32 %v129_v24, %v53_v19  ;;  %v135_v38 = vmul.f32 %v131_v25, %v57_v20 }
  0x90   :  { %v73_v31 = vrot.slane %v69_v30, %v44_v7  ;;  %v77_v32 = vrot.slane %v69_v30, %v48_v8  ;;  %v81_v33 = vrot.slane %v69_v30, %v52_v9  ;;  %v85_v34 = vrot.slane %v69_v30, %v56_v10 }
  0x92   :  { %v90_v39 = vadd.f32 %v73_v31, %v62_v26  ;;  %v91_v40 = vadd.f32 %v77_v32, %v63_v27  ;;  %v92_v41 = vadd.f32 %v81_v33, %v64_v28  ;;  %v93_v42 = vadd.f32 %v85_v34, %v65_v29 }
  0x93   :  { %v136_v43 = vadd.f32 %v132_v35, %v73_v31  ;;  %v137_v44 = vadd.f32 %v133_v36, %v77_v32  ;;  %v138_v45 = vadd.f32 %v134_v37, %v81_v33  ;;  %v139_v46 = vadd.f32 %v135_v38, %v85_v34 }
  0x94   :  { %v98_v47 = vcombine.low %v90_v39, %v92_v41  ;;  %v99_v48 = vcombine.low %v91_v40, %v93_v42 }
  0x95   :  { %v144_v49 = vcombine.low %v136_v43, %v138_v45  ;;  %v145_v50 = vcombine.low %v137_v44, %v139_v46 }
  0x96   :  { %v106_v51 = vrot.slane %v98_v47, %v105_v23  ;;  %v113_v52 = vrot.slane %v99_v48, %v105_v23 }
  0x97   :  { %v152_v53 = vrot.slane %v144_v49, %v105_v23  ;;  %v159_v54 = vrot.slane %v145_v50, %v105_v23 }
  0x98   :  { %v114_v55 = vcombine.low %v106_v51, %v113_v52 }
  0x99   :  { %v160_v56 = vcombine.low %v152_v53, %v159_v54 }
  0x9a   :  { %188 = vst.sshfl [vmem:[#allocation5] sm:$0xff pattern:$0x75316420] %v114_v55 }
  0x9b   :  { %189 = vst.sshfl [vmem:[#allocation5 + $0x8] sm:$0xff pattern:$0x75316420] %v160_v56 }
  0x9c   :  { %230 = shalt.err (!%p227_p9)
}
  0x9d   :  { %s249_s23 = smov 128   ;;  %s250_s24 = smov 8  }
  0x9e   :  { %182 = dma.vmem_to_hbm [thread:$0]  %s177_s1, 256, %s286_s3, [#allocation4], %s249_s23, %s249_s23, %s250_s24  }
  0x9f   :  { %241 = dma.done.wait [#allocation4], 256  }
  0xa0   :  { %242 = vsyncadd [#allocation4], 4294967040 }
  0xa1   :  { %186 = vsyncpa [#allocation3], 1 }
  0xa2   :  { %187 = vsyncpa [#allocation4], 1 }

</bundles_post_ra>
